<compile_context>
chip_gen: v5e
topology: v5e:2x2
jax: 0.10.0
libtpu: 0.0.40
codegen_flags: <defaults>
</compile_context>

<pallas_src>
import jax
import jax.numpy as jnp
from jax.experimental import pallas as pl
from jax.experimental.pallas import tpu as pltpu

EPS = 1e-5
LANE = 128


def _round_up(x, m):
    return ((x + m - 1) // m) * m


# ---------------------------------------------------------------------------
# Fused kernel
# ---------------------------------------------------------------------------
def _bn_relu(z, gamma, beta, inv_rows):
    """Training-mode BatchNorm1d (biased batch variance, eps=1e-5) + ReLU."""
    mean = jnp.sum(z, axis=0, keepdims=True) * inv_rows
    zc = z - mean                                   # hoisted; reused below
    var = jnp.sum(zc * zc, axis=0, keepdims=True) * inv_rows
    y = gamma * (zc * jax.lax.rsqrt(var + EPS)) + beta
    return jnp.maximum(y, 0.0)


def _make_gin_kernel(batch, nodes, n_gin, n_mlp):
    rows = batch * nodes
    inv_rows = 1.0 / float(rows)
    mlp_is_linear = (n_mlp == 1)

    def kernel(eps_ref, adj_ref, x_ref, *refs):
        out_ref = refs[-1]
        params = refs[:-1]
        idx = [0]

        def nxt():
            r = params[idx[0]]
            idx[0] += 1
            return r[...]

        x = x_ref[...]                                          # [rows, F0_p]
        for l in range(n_gin):
            # --- neighbor aggregation: per-graph adj @ x (2-D MXU matmuls) ---
            pieces = []
            for g in range(batch):
                xg = x[g * nodes:(g + 1) * nodes, :]
                pieces.append(
                    jnp.dot(adj_ref[g], xg, preferred_element_type=jnp.float32))
            neighbor = pieces[0] if batch == 1 else jnp.concatenate(pieces, axis=0)
            h = (1.0 + eps_ref[l]) * x + neighbor               # [rows, F_p]

            # --- inner MLP (weights pre-transposed to [in, out]) ---
            if mlp_is_linear:
                w = nxt()
                b = nxt()
                h = jnp.dot(h, w, preferred_element_type=jnp.float32) + b
            else:
                for _ in range(n_mlp - 1):
                    w = nxt()
                    b = nxt()
                    gma = nxt()
                    bta = nxt()
                    z = jnp.dot(h, w, preferred_element_type=jnp.float32) + b
                    h = _bn_relu(z, gma, bta, inv_rows)
                w = nxt()
                b = nxt()
                h = jnp.dot(h, w, preferred_element_type=jnp.float32) + b

            # --- outer (GIN-layer) BatchNorm1d + ReLU ---
            gma = nxt()
            bta = nxt()
            x = _bn_relu(h, gma, bta, inv_rows)

        # --- final fc (lane-dense padded output) ---
        w = nxt()
        b = nxt()
        out_ref[...] = jnp.dot(x, w, preferred_element_type=jnp.float32) + b

    return kernel


# ---------------------------------------------------------------------------
# Wrapper (parameter init mirroring PyTorch defaults, padding, pallas_call)
# ---------------------------------------------------------------------------
class GINEncoderPallas:
    """Pallas/TPU mirror of the PyTorch GINEncoder (training-mode BatchNorm)."""

    def __init__(self, input_dim, hidden_dim, latent_dim, num_layers,
                 num_mlp_layers, key):
        if num_layers < 2:
            raise ValueError("GINEncoderPallas requires num_layers >= 2")
        if num_mlp_layers < 1:
            raise ValueError("number of layers should be positive!")
        self.input_dim = input_dim
        self.hidden_dim = hidden_dim
        self.latent_dim = latent_dim
        self.num_layers = num_layers
        self.num_mlp_layers = num_mlp_layers
        self.n_gin = num_layers - 1

        # nn.Parameter(torch.zeros(num_layers - 1))
        self.eps = jnp.zeros((self.n_gin,), jnp.float32)

        keys = jax.random.split(key, self.n_gin + 1)
        self.mlps = []
        for l in range(self.n_gin):
            in_dim = input_dim if l == 0 else hidden_dim
            self.mlps.append(
                self._init_mlp(keys[l], num_mlp_layers, in_dim, hidden_dim, hidden_dim))
        # Outer BatchNorm1d(hidden_dim): gamma=1, beta=0 (PyTorch defaults).
        self.batch_norms = [
            (jnp.ones((hidden_dim,), jnp.float32), jnp.zeros((hidden_dim,), jnp.float32))
            for _ in range(self.n_gin)
        ]
        self.fc = self._init_linear(keys[-1], hidden_dim, latent_dim)

        # Lane-dense padded dims + pre-transposed / zero-padded parameters.
        self._fi_p = _round_up(input_dim, LANE)
        self._h_p = _round_up(hidden_dim, LANE)
        self._l_p = _round_up(latent_dim, LANE)
        self._flat_params = self._build_padded_params()

    # -- PyTorch-style nn.Linear init: U(-1/sqrt(in), 1/sqrt(in)) for W and b --
    @staticmethod
    def _init_linear(key, in_dim, out_dim):
        kw, kb = jax.random.split(key)
        bound = 1.0 / (in_dim ** 0.5)
        w = jax.random.uniform(kw, (out_dim, in_dim), jnp.float32, -bound, bound)
        b = jax.random.uniform(kb, (out_dim,), jnp.float32, -bound, bound)
        return w, b

    def _init_mlp(self, key, num_mlp_layers, in_dim, hidden_dim, out_dim):
        if num_mlp_layers == 1:
            return self._init_linear(key, in_dim, out_dim)
        keys = jax.random.split(key, num_mlp_layers)
        dims = [in_dim] + [hidden_dim] * (num_mlp_layers - 1) + [out_dim]
        linears = [self._init_linear(keys[m], dims[m], dims[m + 1])
                   for m in range(num_mlp_layers)]
        bns = [(jnp.ones((dims[m + 1],), jnp.float32),
                jnp.zeros((dims[m + 1],), jnp.float32))
               for m in range(num_mlp_layers - 1)]
        return linears, bns

    # -- padding / pre-transposition helpers ---------------------------------
    @staticmethod
    def _pad_w(w, in_p, out_p):
        # PyTorch [out, in] -> pre-transposed [in, out], zero-padded.
        wt = w.T
        buf = jnp.zeros((in_p, out_p), jnp.float32)
        return buf.at[:wt.shape[0], :wt.shape[1]].set(wt)

    @staticmethod
    def _pad_v(v, out_p):
        buf = jnp.zeros((1, out_p), jnp.float32)
        return buf.at[0, :v.shape[0]].set(v)

    def _build_padded_params(self):
        flat = []
        for l in range(self.n_gin):
            in_p = self._fi_p if l == 0 else self._h_p
            mlp = self.mlps[l]
            if self.num_mlp_layers == 1:
                w, b = mlp
                flat += [self._pad_w(w, in_p, self._h_p), self._pad_v(b, self._h_p)]
            else:
                linears, bns = mlp
                cur_in = in_p
                for m in range(self.num_mlp_layers - 1):
                    w, b = linears[m]
                    g, bt = bns[m]
                    flat += [self._pad_w(w, cur_in, self._h_p),
                             self._pad_v(b, self._h_p),
                             self._pad_v(g, self._h_p),
                             self._pad_v(bt, self._h_p)]
                    cur_in = self._h_p
                w, b = linears[-1]
                flat += [self._pad_w(w, self._h_p, self._h_p), self._pad_v(b, self._h_p)]
            g, bt = self.batch_norms[l]
            flat += [self._pad_v(g, self._h_p), self._pad_v(bt, self._h_p)]
        w, b = self.fc
        flat += [self._pad_w(w, self._h_p, self._l_p), self._pad_v(b, self._l_p)]
        return flat

    def _cost(self, b, n):
        rows = b * n
        flops, trans = 0, 0
        for l in range(self.n_gin):
            in_p = self._fi_p if l == 0 else self._h_p
            flops += 2 * b * n * n * in_p + 3 * rows * in_p          # adj matmul + agg
            flops += 2 * rows * in_p * self._h_p                     # first MLP linear
            if self.num_mlp_layers > 1:
                flops += 2 * rows * self._h_p * self._h_p * (self.num_mlp_layers - 1)
            n_bn = 1 + max(self.num_mlp_layers - 1, 0)
            flops += 10 * rows * self._h_p * n_bn                    # BN + ReLU epilogues
            trans += n_bn * self._h_p                                # rsqrt per feature
        flops += 2 * rows * self._h_p * self._l_p                    # final fc
        return int(flops), int(trans)

    # -- forward ---------------------------------------------------------------
    def __call__(self, opt, adj):
        b, n, f = opt.shape
        assert f == self.input_dim
        rows = b * n

        x_flat = jnp.zeros((rows, self._fi_p), jnp.float32)
        x_flat = x_flat.at[:, :f].set(opt.reshape(rows, f).astype(jnp.float32))
        adj = adj.astype(jnp.float32)

        kernel = _make_gin_kernel(b, n, self.n_gin, self.num_mlp_layers)

        inputs = [self.eps, adj, x_flat] + list(self._flat_params)
        io_bytes = sum(int(a.size) * 4 for a in inputs) + rows * self._l_p * 4
        flops, trans = self._cost(b, n)

        out = pl.pallas_call(
            kernel,
            out_shape=jax.ShapeDtypeStruct((rows, self._l_p), jnp.float32),
            in_specs=[pl.BlockSpec(memory_space=pltpu.MemorySpace.SMEM)]
            + [pl.BlockSpec(memory_space=pltpu.MemorySpace.VMEM)] * (len(inputs) - 1),
            out_specs=pl.BlockSpec(memory_space=pltpu.MemorySpace.VMEM),
            compiler_params=pltpu.CompilerParams(
                vmem_limit_bytes=int(min(max(8 * io_bytes, 8 << 20), 32 << 20))),
            cost_estimate=pl.CostEstimate(
                flops=flops, transcendentals=trans, bytes_accessed=io_bytes),
        )(*inputs)

        return out[:, :self.latent_dim].reshape(b, n, self.latent_dim)


# ---------------------------------------------------------------------------
# Pure-JAX reference (unpadded) for correctness checking
# ---------------------------------------------------------------------------
def _bn_ref(z, gamma, beta):
    mean = z.mean(axis=0, keepdims=True)
    var = ((z - mean) ** 2).mean(axis=0, keepdims=True)   # biased (training mode)
    return gamma * (z - mean) * jax.lax.rsqrt(var + EPS) + beta


def _mlp_ref(mlp, num_mlp_layers, h):
    hp = jax.lax.Precision.HIGHEST
    if num_mlp_layers == 1:
        w, b = mlp
        return jnp.dot(h, w.T, precision=hp) + b
    linears, bns = mlp
    for m in range(num_mlp_layers - 1):
        w, b = linears[m]
        g, bt = bns[m]
        h = jnp.maximum(_bn_ref(jnp.dot(h, w.T, precision=hp) + b, g, bt), 0.0)
    w, b = linears[-1]
    return jnp.dot(h, w.T, precision=hp) + b


def _reference_forward(enc, opt, adj):
    hp = jax.lax.Precision.HIGHEST
    b, n, f = opt.shape
    x = opt
    for l in range(enc.n_gin):
        neighbor = jnp.einsum("bij,bjf->bif", adj, x, precision=hp)
        agg = (1.0 + enc.eps[l]) * x.reshape(b * n, -1) + neighbor.reshape(b * n, -1)
        h = _mlp_ref(enc.mlps[l], enc.num_mlp_layers, agg)
        g, bt = enc.batch_norms[l]
        x = jnp.maximum(_bn_ref(h, g, bt), 0.0).reshape(b, n, -1)
    w, bb = enc.fc
    return jnp.dot(x, w.T, precision=hp) + bb


if __name__ == "__main__":
    key = jax.random.PRNGKey(0)
    k_param, k_x, k_adj = jax.random.split(key, 3)

    input_dim, hidden_dim, latent_dim = 16, 32, 8
    num_layers, num_mlp_layers = 3, 2
    batch, node_num = 2, 8

    enc = GINEncoderPallas(input_dim, hidden_dim, latent_dim,
                           num_layers, num_mlp_layers, k_param)

    opt = jax.random.normal(k_x, (batch, node_num, input_dim), jnp.float32)
    adj = (jax.random.uniform(k_adj, (batch, node_num, node_num)) < 0.5).astype(jnp.float32)

    z = enc(opt, adj)
    z = jax.block_until_ready(z)

    ref = _reference_forward(enc, opt, adj)
    assert z.shape == (batch, node_num, latent_dim)
    err = float(jnp.max(jnp.abs(z - ref)))
    assert jnp.allclose(z, ref, atol=2e-3, rtol=2e-3), f"mismatch vs reference: {err}"

    print("KERNEL_OK")
</pallas_src>

<mosaic_0001>
module attributes {stable_mosaic.version = 11 : i64} {
  func.func @kernel(%arg0: memref<2xf32, #tpu.memory_space<smem>>, %arg1: memref<2x8x8xf32, #tpu.memory_space<vmem>>, %arg2: memref<16x128xf32, #tpu.memory_space<vmem>>, %arg3: memref<128x128xf32, #tpu.memory_space<vmem>>, %arg4: memref<1x128xf32, #tpu.memory_space<vmem>>, %arg5: memref<1x128xf32, #tpu.memory_space<vmem>>, %arg6: memref<1x128xf32, #tpu.memory_space<vmem>>, %arg7: memref<128x128xf32, #tpu.memory_space<vmem>>, %arg8: memref<1x128xf32, #tpu.memory_space<vmem>>, %arg9: memref<1x128xf32, #tpu.memory_space<vmem>>, %arg10: memref<1x128xf32, #tpu.memory_space<vmem>>, %arg11: memref<128x128xf32, #tpu.memory_space<vmem>>, %arg12: memref<1x128xf32, #tpu.memory_space<vmem>>, %arg13: memref<1x128xf32, #tpu.memory_space<vmem>>, %arg14: memref<1x128xf32, #tpu.memory_space<vmem>>, %arg15: memref<128x128xf32, #tpu.memory_space<vmem>>, %arg16: memref<1x128xf32, #tpu.memory_space<vmem>>, %arg17: memref<1x128xf32, #tpu.memory_space<vmem>>, %arg18: memref<1x128xf32, #tpu.memory_space<vmem>>, %arg19: memref<128x128xf32, #tpu.memory_space<vmem>>, %arg20: memref<1x128xf32, #tpu.memory_space<vmem>>, %arg21: memref<16x128xf32, #tpu.memory_space<vmem>>) attributes {dimension_semantics = [], scalar_prefetch = 0 : i64, scratch_operands = 0 : i64, tpu.core_type = #tpu.core_type<tc>} {
    %c0 = arith.constant 0 : index
    %c0_0 = arith.constant 0 : index
    %0 = vector.load %arg2[%c0, %c0_0] : memref<16x128xf32, #tpu.memory_space<vmem>>, vector<16x128xf32>
    %1 = vector.extract_strided_slice %0 {offsets = [0, 0], sizes = [8, 128], strides = [1, 1]} : vector<16x128xf32> to vector<8x128xf32>
    %c0_1 = arith.constant 0 : index
    %c0_2 = arith.constant 0 : index
    %c0_3 = arith.constant 0 : index
    %2 = vector.load %arg1[%c0_1, %c0_2, %c0_3] : memref<2x8x8xf32, #tpu.memory_space<vmem>>, vector<1x8x8xf32>
    %3 = vector.shape_cast %2 : vector<1x8x8xf32> to vector<8x8xf32>
    %cst = arith.constant dense<0.000000e+00> : vector<8x128xf32>
    %4 = tpu.matmul %3, %1, %cst {dimension_numbers = #tpu.dot_dimension_numbers<[1], [0], [0], [1], [0, 0, 1, 1], [], []>} : vector<8x8xf32>, vector<8x128xf32>, vector<8x128xf32> -> vector<8x128xf32>
    %5 = vector.extract_strided_slice %0 {offsets = [8, 0], sizes = [8, 128], strides = [1, 1]} : vector<16x128xf32> to vector<8x128xf32>
    %c1 = arith.constant 1 : index
    %c0_4 = arith.constant 0 : index
    %c0_5 = arith.constant 0 : index
    %6 = vector.load %arg1[%c1, %c0_4, %c0_5] : memref<2x8x8xf32, #tpu.memory_space<vmem>>, vector<1x8x8xf32>
    %7 = vector.shape_cast %6 : vector<1x8x8xf32> to vector<8x8xf32>
    %cst_6 = arith.constant dense<0.000000e+00> : vector<8x128xf32>
    %8 = tpu.matmul %7, %5, %cst_6 {dimension_numbers = #tpu.dot_dimension_numbers<[1], [0], [0], [1], [0, 0, 1, 1], [], []>} : vector<8x8xf32>, vector<8x128xf32>, vector<8x128xf32> -> vector<8x128xf32>
    %9 = tpu.concatenate %4, %8 in 0 : vector<8x128xf32>, vector<8x128xf32> -> vector<16x128xf32>
    %c0_7 = arith.constant 0 : index
    %10 = memref.load %arg0[%c0_7] : memref<2xf32, #tpu.memory_space<smem>>
    %cst_8 = arith.constant 1.000000e+00 : f32
    %11 = arith.addf %cst_8, %10 : f32
    %12 = vector.broadcast %11 : f32 to vector<16x128xf32>
    %13 = arith.mulf %12, %0 : vector<16x128xf32>
    %14 = arith.addf %13, %9 : vector<16x128xf32>
    %c0_9 = arith.constant 0 : index
    %c0_10 = arith.constant 0 : index
    %15 = vector.load %arg3[%c0_9, %c0_10] : memref<128x128xf32, #tpu.memory_space<vmem>>, vector<128x128xf32>
    %c0_11 = arith.constant 0 : index
    %c0_12 = arith.constant 0 : index
    %16 = vector.load %arg4[%c0_11, %c0_12] : memref<1x128xf32, #tpu.memory_space<vmem>>, vector<1x128xf32>
    %c0_13 = arith.constant 0 : index
    %c0_14 = arith.constant 0 : index
    %17 = vector.load %arg5[%c0_13, %c0_14] : memref<1x128xf32, #tpu.memory_space<vmem>>, vector<1x128xf32>
    %c0_15 = arith.constant 0 : index
    %c0_16 = arith.constant 0 : index
    %18 = vector.load %arg6[%c0_15, %c0_16] : memref<1x128xf32, #tpu.memory_space<vmem>>, vector<1x128xf32>
    %cst_17 = arith.constant dense<0.000000e+00> : vector<16x128xf32>
    %19 = tpu.matmul %14, %15, %cst_17 {dimension_numbers = #tpu.dot_dimension_numbers<[1], [0], [0], [1], [0, 0, 1, 1], [], []>} : vector<16x128xf32>, vector<128x128xf32>, vector<16x128xf32> -> vector<16x128xf32>
    %20 = vector.broadcast %16 : vector<1x128xf32> to vector<16x128xf32>
    %21 = arith.addf %19, %20 : vector<16x128xf32>
    %cst_18 = arith.constant dense<0.000000e+00> : vector<128xf32>
    %22 = vector.multi_reduction <add>, %21, %cst_18 [0] : vector<16x128xf32> to vector<128xf32>
    %23 = vector.shape_cast %22 : vector<128xf32> to vector<1x128xf32>
    %cst_19 = arith.constant 6.250000e-02 : f32
    %24 = vector.broadcast %cst_19 : f32 to vector<1x128xf32>
    %25 = arith.mulf %23, %24 : vector<1x128xf32>
    %26 = vector.broadcast %25 : vector<1x128xf32> to vector<16x128xf32>
    %27 = arith.subf %21, %26 : vector<16x128xf32>
    %28 = arith.mulf %27, %27 : vector<16x128xf32>
    %cst_20 = arith.constant dense<0.000000e+00> : vector<128xf32>
    %29 = vector.multi_reduction <add>, %28, %cst_20 [0] : vector<16x128xf32> to vector<128xf32>
    %30 = vector.shape_cast %29 : vector<128xf32> to vector<1x128xf32>
    %cst_21 = arith.constant 6.250000e-02 : f32
    %31 = vector.broadcast %cst_21 : f32 to vector<1x128xf32>
    %32 = arith.mulf %30, %31 : vector<1x128xf32>
    %cst_22 = arith.constant 9.99999974E-6 : f32
    %33 = vector.broadcast %cst_22 : f32 to vector<1x128xf32>
    %34 = arith.addf %32, %33 : vector<1x128xf32>
    %35 = math.rsqrt %34 : vector<1x128xf32>
    %36 = vector.broadcast %35 : vector<1x128xf32> to vector<16x128xf32>
    %37 = arith.mulf %27, %36 : vector<16x128xf32>
    %38 = vector.broadcast %17 : vector<1x128xf32> to vector<16x128xf32>
    %39 = arith.mulf %38, %37 : vector<16x128xf32>
    %40 = vector.broadcast %18 : vector<1x128xf32> to vector<16x128xf32>
    %41 = arith.addf %39, %40 : vector<16x128xf32>
    %cst_23 = arith.constant 0.000000e+00 : f32
    %42 = vector.broadcast %cst_23 : f32 to vector<16x128xf32>
    %43 = arith.maximumf %41, %42 : vector<16x128xf32>
    %c0_24 = arith.constant 0 : index
    %c0_25 = arith.constant 0 : index
    %44 = vector.load %arg7[%c0_24, %c0_25] : memref<128x128xf32, #tpu.memory_space<vmem>>, vector<128x128xf32>
    %c0_26 = arith.constant 0 : index
    %c0_27 = arith.constant 0 : index
    %45 = vector.load %arg8[%c0_26, %c0_27] : memref<1x128xf32, #tpu.memory_space<vmem>>, vector<1x128xf32>
    %cst_28 = arith.constant dense<0.000000e+00> : vector<16x128xf32>
    %46 = tpu.matmul %43, %44, %cst_28 {dimension_numbers = #tpu.dot_dimension_numbers<[1], [0], [0], [1], [0, 0, 1, 1], [], []>} : vector<16x128xf32>, vector<128x128xf32>, vector<16x128xf32> -> vector<16x128xf32>
    %47 = vector.broadcast %45 : vector<1x128xf32> to vector<16x128xf32>
    %48 = arith.addf %46, %47 : vector<16x128xf32>
    %c0_29 = arith.constant 0 : index
    %c0_30 = arith.constant 0 : index
    %49 = vector.load %arg9[%c0_29, %c0_30] : memref<1x128xf32, #tpu.memory_space<vmem>>, vector<1x128xf32>
    %c0_31 = arith.constant 0 : index
    %c0_32 = arith.constant 0 : index
    %50 = vector.load %arg10[%c0_31, %c0_32] : memref<1x128xf32, #tpu.memory_space<vmem>>, vector<1x128xf32>
    %cst_33 = arith.constant dense<0.000000e+00> : vector<128xf32>
    %51 = vector.multi_reduction <add>, %48, %cst_33 [0] : vector<16x128xf32> to vector<128xf32>
    %52 = vector.shape_cast %51 : vector<128xf32> to vector<1x128xf32>
    %cst_34 = arith.constant 6.250000e-02 : f32
    %53 = vector.broadcast %cst_34 : f32 to vector<1x128xf32>
    %54 = arith.mulf %52, %53 : vector<1x128xf32>
    %55 = vector.broadcast %54 : vector<1x128xf32> to vector<16x128xf32>
    %56 = arith.subf %48, %55 : vector<16x128xf32>
    %57 = arith.mulf %56, %56 : vector<16x128xf32>
    %cst_35 = arith.constant dense<0.000000e+00> : vector<128xf32>
    %58 = vector.multi_reduction <add>, %57, %cst_35 [0] : vector<16x128xf32> to vector<128xf32>
    %59 = vector.shape_cast %58 : vector<128xf32> to vector<1x128xf32>
    %cst_36 = arith.constant 6.250000e-02 : f32
    %60 = vector.broadcast %cst_36 : f32 to vector<1x128xf32>
    %61 = arith.mulf %59, %60 : vector<1x128xf32>
    %cst_37 = arith.constant 9.99999974E-6 : f32
    %62 = vector.broadcast %cst_37 : f32 to vector<1x128xf32>
    %63 = arith.addf %61, %62 : vector<1x128xf32>
    %64 = math.rsqrt %63 : vector<1x128xf32>
    %65 = vector.broadcast %64 : vector<1x128xf32> to vector<16x128xf32>
    %66 = arith.mulf %56, %65 : vector<16x128xf32>
    %67 = vector.broadcast %49 : vector<1x128xf32> to vector<16x128xf32>
    %68 = arith.mulf %67, %66 : vector<16x128xf32>
    %69 = vector.broadcast %50 : vector<1x128xf32> to vector<16x128xf32>
    %70 = arith.addf %68, %69 : vector<16x128xf32>
    %cst_38 = arith.constant 0.000000e+00 : f32
    %71 = vector.broadcast %cst_38 : f32 to vector<16x128xf32>
    %72 = arith.maximumf %70, %71 : vector<16x128xf32>
    %73 = vector.extract_strided_slice %72 {offsets = [0, 0], sizes = [8, 128], strides = [1, 1]} : vector<16x128xf32> to vector<8x128xf32>
    %c0_39 = arith.constant 0 : index
    %c0_40 = arith.constant 0 : index
    %c0_41 = arith.constant 0 : index
    %74 = vector.load %arg1[%c0_39, %c0_40, %c0_41] : memref<2x8x8xf32, #tpu.memory_space<vmem>>, vector<1x8x8xf32>
    %75 = vector.shape_cast %74 : vector<1x8x8xf32> to vector<8x8xf32>
    %cst_42 = arith.constant dense<0.000000e+00> : vector<8x128xf32>
    %76 = tpu.matmul %75, %73, %cst_42 {dimension_numbers = #tpu.dot_dimension_numbers<[1], [0], [0], [1], [0, 0, 1, 1], [], []>} : vector<8x8xf32>, vector<8x128xf32>, vector<8x128xf32> -> vector<8x128xf32>
    %77 = vector.extract_strided_slice %72 {offsets = [8, 0], sizes = [8, 128], strides = [1, 1]} : vector<16x128xf32> to vector<8x128xf32>
    %c1_43 = arith.constant 1 : index
    %c0_44 = arith.constant 0 : index
    %c0_45 = arith.constant 0 : index
    %78 = vector.load %arg1[%c1_43, %c0_44, %c0_45] : memref<2x8x8xf32, #tpu.memory_space<vmem>>, vector<1x8x8xf32>
    %79 = vector.shape_cast %78 : vector<1x8x8xf32> to vector<8x8xf32>
    %cst_46 = arith.constant dense<0.000000e+00> : vector<8x128xf32>
    %80 = tpu.matmul %79, %77, %cst_46 {dimension_numbers = #tpu.dot_dimension_numbers<[1], [0], [0], [1], [0, 0, 1, 1], [], []>} : vector<8x8xf32>, vector<8x128xf32>, vector<8x128xf32> -> vector<8x128xf32>
    %81 = tpu.concatenate %76, %80 in 0 : vector<8x128xf32>, vector<8x128xf32> -> vector<16x128xf32>
    %c1_47 = arith.constant 1 : index
    %82 = memref.load %arg0[%c1_47] : memref<2xf32, #tpu.memory_space<smem>>
    %cst_48 = arith.constant 1.000000e+00 : f32
    %83 = arith.addf %cst_48, %82 : f32
    %84 = vector.broadcast %83 : f32 to vector<16x128xf32>
    %85 = arith.mulf %84, %72 : vector<16x128xf32>
    %86 = arith.addf %85, %81 : vector<16x128xf32>
    %c0_49 = arith.constant 0 : index
    %c0_50 = arith.constant 0 : index
    %87 = vector.load %arg11[%c0_49, %c0_50] : memref<128x128xf32, #tpu.memory_space<vmem>>, vector<128x128xf32>
    %c0_51 = arith.constant 0 : index
    %c0_52 = arith.constant 0 : index
    %88 = vector.load %arg12[%c0_51, %c0_52] : memref<1x128xf32, #tpu.memory_space<vmem>>, vector<1x128xf32>
    %c0_53 = arith.constant 0 : index
    %c0_54 = arith.constant 0 : index
    %89 = vector.load %arg13[%c0_53, %c0_54] : memref<1x128xf32, #tpu.memory_space<vmem>>, vector<1x128xf32>
    %c0_55 = arith.constant 0 : index
    %c0_56 = arith.constant 0 : index
    %90 = vector.load %arg14[%c0_55, %c0_56] : memref<1x128xf32, #tpu.memory_space<vmem>>, vector<1x128xf32>
    %cst_57 = arith.constant dense<0.000000e+00> : vector<16x128xf32>
    %91 = tpu.matmul %86, %87, %cst_57 {dimension_numbers = #tpu.dot_dimension_numbers<[1], [0], [0], [1], [0, 0, 1, 1], [], []>} : vector<16x128xf32>, vector<128x128xf32>, vector<16x128xf32> -> vector<16x128xf32>
    %92 = vector.broadcast %88 : vector<1x128xf32> to vector<16x128xf32>
    %93 = arith.addf %91, %92 : vector<16x128xf32>
    %cst_58 = arith.constant dense<0.000000e+00> : vector<128xf32>
    %94 = vector.multi_reduction <add>, %93, %cst_58 [0] : vector<16x128xf32> to vector<128xf32>
    %95 = vector.shape_cast %94 : vector<128xf32> to vector<1x128xf32>
    %cst_59 = arith.constant 6.250000e-02 : f32
    %96 = vector.broadcast %cst_59 : f32 to vector<1x128xf32>
    %97 = arith.mulf %95, %96 : vector<1x128xf32>
    %98 = vector.broadcast %97 : vector<1x128xf32> to vector<16x128xf32>
    %99 = arith.subf %93, %98 : vector<16x128xf32>
    %100 = arith.mulf %99, %99 : vector<16x128xf32>
    %cst_60 = arith.constant dense<0.000000e+00> : vector<128xf32>
    %101 = vector.multi_reduction <add>, %100, %cst_60 [0] : vector<16x128xf32> to vector<128xf32>
    %102 = vector.shape_cast %101 : vector<128xf32> to vector<1x128xf32>
    %cst_61 = arith.constant 6.250000e-02 : f32
    %103 = vector.broadcast %cst_61 : f32 to vector<1x128xf32>
    %104 = arith.mulf %102, %103 : vector<1x128xf32>
    %cst_62 = arith.constant 9.99999974E-6 : f32
    %105 = vector.broadcast %cst_62 : f32 to vector<1x128xf32>
    %106 = arith.addf %104, %105 : vector<1x128xf32>
    %107 = math.rsqrt %106 : vector<1x128xf32>
    %108 = vector.broadcast %107 : vector<1x128xf32> to vector<16x128xf32>
    %109 = arith.mulf %99, %108 : vector<16x128xf32>
    %110 = vector.broadcast %89 : vector<1x128xf32> to vector<16x128xf32>
    %111 = arith.mulf %110, %109 : vector<16x128xf32>
    %112 = vector.broadcast %90 : vector<1x128xf32> to vector<16x128xf32>
    %113 = arith.addf %111, %112 : vector<16x128xf32>
    %cst_63 = arith.constant 0.000000e+00 : f32
    %114 = vector.broadcast %cst_63 : f32 to vector<16x128xf32>
    %115 = arith.maximumf %113, %114 : vector<16x128xf32>
    %c0_64 = arith.constant 0 : index
    %c0_65 = arith.constant 0 : index
    %116 = vector.load %arg15[%c0_64, %c0_65] : memref<128x128xf32, #tpu.memory_space<vmem>>, vector<128x128xf32>
    %c0_66 = arith.constant 0 : index
    %c0_67 = arith.constant 0 : index
    %117 = vector.load %arg16[%c0_66, %c0_67] : memref<1x128xf32, #tpu.memory_space<vmem>>, vector<1x128xf32>
    %cst_68 = arith.constant dense<0.000000e+00> : vector<16x128xf32>
    %118 = tpu.matmul %115, %116, %cst_68 {dimension_numbers = #tpu.dot_dimension_numbers<[1], [0], [0], [1], [0, 0, 1, 1], [], []>} : vector<16x128xf32>, vector<128x128xf32>, vector<16x128xf32> -> vector<16x128xf32>
    %119 = vector.broadcast %117 : vector<1x128xf32> to vector<16x128xf32>
    %120 = arith.addf %118, %119 : vector<16x128xf32>
    %c0_69 = arith.constant 0 : index
    %c0_70 = arith.constant 0 : index
    %121 = vector.load %arg17[%c0_69, %c0_70] : memref<1x128xf32, #tpu.memory_space<vmem>>, vector<1x128xf32>
    %c0_71 = arith.constant 0 : index
    %c0_72 = arith.constant 0 : index
    %122 = vector.load %arg18[%c0_71, %c0_72] : memref<1x128xf32, #tpu.memory_space<vmem>>, vector<1x128xf32>
    %cst_73 = arith.constant dense<0.000000e+00> : vector<128xf32>
    %123 = vector.multi_reduction <add>, %120, %cst_73 [0] : vector<16x128xf32> to vector<128xf32>
    %124 = vector.shape_cast %123 : vector<128xf32> to vector<1x128xf32>
    %cst_74 = arith.constant 6.250000e-02 : f32
    %125 = vector.broadcast %cst_74 : f32 to vector<1x128xf32>
    %126 = arith.mulf %124, %125 : vector<1x128xf32>
    %127 = vector.broadcast %126 : vector<1x128xf32> to vector<16x128xf32>
    %128 = arith.subf %120, %127 : vector<16x128xf32>
    %129 = arith.mulf %128, %128 : vector<16x128xf32>
    %cst_75 = arith.constant dense<0.000000e+00> : vector<128xf32>
    %130 = vector.multi_reduction <add>, %129, %cst_75 [0] : vector<16x128xf32> to vector<128xf32>
    %131 = vector.shape_cast %130 : vector<128xf32> to vector<1x128xf32>
    %cst_76 = arith.constant 6.250000e-02 : f32
    %132 = vector.broadcast %cst_76 : f32 to vector<1x128xf32>
    %133 = arith.mulf %131, %132 : vector<1x128xf32>
    %cst_77 = arith.constant 9.99999974E-6 : f32
    %134 = vector.broadcast %cst_77 : f32 to vector<1x128xf32>
    %135 = arith.addf %133, %134 : vector<1x128xf32>
    %136 = math.rsqrt %135 : vector<1x128xf32>
    %137 = vector.broadcast %136 : vector<1x128xf32> to vector<16x128xf32>
    %138 = arith.mulf %128, %137 : vector<16x128xf32>
    %139 = vector.broadcast %121 : vector<1x128xf32> to vector<16x128xf32>
    %140 = arith.mulf %139, %138 : vector<16x128xf32>
    %141 = vector.broadcast %122 : vector<1x128xf32> to vector<16x128xf32>
    %142 = arith.addf %140, %141 : vector<16x128xf32>
    %cst_78 = arith.constant 0.000000e+00 : f32
    %143 = vector.broadcast %cst_78 : f32 to vector<16x128xf32>
    %144 = arith.maximumf %142, %143 : vector<16x128xf32>
    %c0_79 = arith.constant 0 : index
    %c0_80 = arith.constant 0 : index
    %145 = vector.load %arg19[%c0_79, %c0_80] : memref<128x128xf32, #tpu.memory_space<vmem>>, vector<128x128xf32>
    %c0_81 = arith.constant 0 : index
    %c0_82 = arith.constant 0 : index
    %146 = vector.load %arg20[%c0_81, %c0_82] : memref<1x128xf32, #tpu.memory_space<vmem>>, vector<1x128xf32>
    %cst_83 = arith.constant dense<0.000000e+00> : vector<16x128xf32>
    %147 = tpu.matmul %144, %145, %cst_83 {dimension_numbers = #tpu.dot_dimension_numbers<[1], [0], [0], [1], [0, 0, 1, 1], [], []>} : vector<16x128xf32>, vector<128x128xf32>, vector<16x128xf32> -> vector<16x128xf32>
    %148 = vector.broadcast %146 : vector<1x128xf32> to vector<16x128xf32>
    %149 = arith.addf %147, %148 : vector<16x128xf32>
    %c0_84 = arith.constant 0 : index
    %c0_85 = arith.constant 0 : index
    %150 = vector.load %arg21[%c0_84, %c0_85] : memref<16x128xf32, #tpu.memory_space<vmem>>, vector<16x128xf32>
    tpu.vector_store %arg21[%c0_84, %c0_85], %149 {strides = array<i32>} : memref<16x128xf32, #tpu.memory_space<vmem>>, vector<16x128xf32>,
    return
  }
}

</mosaic_0001>

<bundles_post_ra>
// kernel: tpu_custom_call.1
= control target key start
LH: loop header
LB: loop body
LE: loop exit
PB: predicated region body
PF: predicated region fallthrough
CT: control target
= control target key end

     0   :  { %s1217_s0 = inlined_call_operand.hbm [shape: f32[2], index: 0, kind: input, shape index: {}]   ;;  %s1218_s1 = inlined_call_operand.hbm [shape: f32[2,8,8], index: 1, kind: input, shape index: {}]   ;;  %s1219_s2 = inlined_call_operand.hbm [shape: f32[16,128], index: 2, kind: input, shape index: {}]   ;;  %s1220_s3 = inlined_call_operand.hbm [shape: f32[128,128], index: 3, kind: input, shape index: {}]   ;;  %s1221_s4 = inlined_call_operand.vmem [shape: f32[1,128], index: 4, kind: input, shape index: {}]   ;;  %s1222_s5 = inlined_call_operand.vmem [shape: f32[1,128], index: 5, kind: input, shape index: {}]   ;;  %s1223_s6 = inlined_call_operand.vmem [shape: f32[1,128], index: 6, kind: input, shape index: {}]   ;;  %s1224_s7 = inlined_call_operand.hbm [shape: f32[128,128], index: 7, kind: input, shape index: {}]   ;;  %s1225_s8 = inlined_call_operand.vmem [shape: f32[1,128], index: 8, kind: input, shape index: {}]   ;;  %s1226_s9 = inlined_call_operand.vmem [shape: f32[1,128], index: 9, kind: input, shape index: {}]   ;;  %s1227_s10 = inlined_call_operand.vmem [shape: f32[1,128], index: 10, kind: input, shape index: {}]   ;;  %s1228_s11 = inlined_call_operand.hbm [shape: f32[128,128], index: 11, kind: input, shape index: {}]   ;;  %s1229_s12 = inlined_call_operand.vmem [shape: f32[1,128], index: 12, kind: input, shape index: {}]   ;;  %s1230_s13 = inlined_call_operand.vmem [shape: f32[1,128], index: 13, kind: input, shape index: {}]   ;;  %s1231_s14 = inlined_call_operand.vmem [shape: f32[1,128], index: 14, kind: input, shape index: {}]   ;;  %s1232_s15 = inlined_call_operand.hbm [shape: f32[128,128], index: 15, kind: input, shape index: {}]   ;;  %s1233_s16 = inlined_call_operand.vmem [shape: f32[1,128], index: 16, kind: input, shape index: {}]   ;;  %s1234_s17 = inlined_call_operand.vmem [shape: f32[1,128], index: 17, kind: input, shape index: {}]   ;;  %s1235_s18 = inlined_call_operand.vmem [shape: f32[1,128], index: 18, kind: input, shape index: {}]   ;;  %s1236_s19 = inlined_call_operand.hbm [shape: f32[128,128], index: 19, kind: input, shape index: {}]   ;;  %s1237_s20 = inlined_call_operand.vmem [shape: f32[1,128], index: 20, kind: input, shape index: {}]   ;;  %s1238_s21 = inlined_call_operand.hbm [shape: f32[16,128], index: 21, kind: output, shape index: {}]  }
   0x1   :  { %1239 = sst [smem:[#allocation23_spill]] %s1217_s0 }
   0x2   :  { %1240 = sst [smem:[#allocation24_spill]] %s1218_s1 }
   0x3   :  { %1241 = sst [smem:[#allocation25_spill]] %s1219_s2 }
   0x4   :  { %1242 = sst [smem:[#allocation26_spill]] %s1220_s3 }
   0x5   :  { %1243 = sst [smem:[#allocation27_spill]] %s1221_s4 }
   0x6   :  { %1244 = sst [smem:[#allocation28_spill]] %s1222_s5 }
   0x7   :  { %26 = vsyncpa [#allocation5], 0 }
   0x8   :  { %27 = vsyncpa [#allocation3], 0 }
   0x9   :  { %28 = vsyncpa [#allocation8], 0 }
   0xa   :  { %29 = vsyncpa [#allocation11], 0 }
   0xb   :  { %30 = vsyncpa [#allocation14], 0 }
   0xc   :  { %31 = vsyncpa [#allocation4], 0  ;;  %s1245_s26 = sld [smem:[#allocation25_spill]]  ;;  %s994_s3 = smov [#allocation7]  }
   0xd   :  { %s60_s28 = sshll.u32 %s994_s3, 4  ;;  %s90_s4 = sshll.u32 %s1224_s7, 4  ;;  %s61_s28 = int_to_ptr.vmem [resolvable:$true] %s60_s28  ;;  %s91_s4 = int_to_ptr.hbm [resolvable:$true] %s90_s4 }
   0xe   :  { %s995_s30 = smov 128   ;;  %s996_s5 = smov 8  }
   0xf   :  { %s997_s22 = smov [#allocation10]   ;;  %s128_s2 = sshll.u32 %s1232_s15, 4  ;;  %s129_s2 = int_to_ptr.hbm [resolvable:$true] %s128_s2 }
  0x10   :  { %s92_s23 = sshll.u32 %s997_s22, 4  ;;  %s998_s29 = smov [#allocation13]   ;;  %s93_s23 = int_to_ptr.vmem [resolvable:$true] %s92_s23 }
  0x11   :  { %98 = dma.hbm_to_vmem [thread:$0]  %s91_s4, 2048, %s93_s23, [#allocation11], %s995_s30, %s995_s30, %s996_s5  }
  0x12   :  { %s58_s27 = sshll.u32 %s1245_s26, 4  ;;  %s1246_s26 = sld [smem:[#allocation23_spill]]  ;;  %s59_s27 = int_to_ptr.hbm [resolvable:$true] %s58_s27 }
  0x13   :  { %66 = dma.hbm_to_vmem [thread:$0]  %s59_s27, 256, %s61_s28, [#allocation8], %s995_s30, %s995_s30, %s996_s5  }
  0x14   :  { %s130_s0 = sshll.u32 %s998_s29, 4  ;;  %s999_s27 = smov [#allocation2]   ;;  %s131_s0 = int_to_ptr.vmem [resolvable:$true] %s130_s0 }
  0x15   :  { %136 = dma.hbm_to_vmem [thread:$0]  %s129_s2, 2048, %s131_s0, [#allocation14], %s995_s30, %s995_s30, %s996_s5  }
  0x16   :  { %s1247_s22 = sld [smem:[#allocation24_spill]]  ;;  %s1000_s4 = smov [#allocation6]  }
  0x17   :  { %s47_s23 = sshll.u32 %s1000_s4, 4  ;;  %s1248_s25 = sld [smem:[#allocation26_spill]]  ;;  %s48_s23 = int_to_ptr.vmem [resolvable:$true] %s47_s23 }
  0x18   :  { %s37_s3 = sshll.u32 %s1246_s26, 4  ;;  %s1001_s2 = smov [#allocation9]   ;;  %s38_s3 = int_to_ptr.hbm [resolvable:$true] %s37_s3 }
  0x19   :  { %40 = dma.hbm_to_smem %s38_s3, 16, %s999_s27, [#allocation5]  }
  0x1a   :  { %s73_s29 = sshll.u32 %s1001_s2, 4  ;;  %s109_s27 = sshll.u32 %s1228_s11, 4  ;;  %s74_s29 = int_to_ptr.vmem [resolvable:$true] %s73_s29  ;;  %s110_s27 = int_to_ptr.hbm [resolvable:$true] %s109_s27 }
  0x1b   :  { %s1002_s4 = smov [#allocation12]  }
  0x1c   :  { %s45_s1 = sshll.u32 %s1247_s22, 4  ;;  %s147_s22 = sshll.u32 %s1236_s19, 4  ;;  %s46_s1 = int_to_ptr.hbm [resolvable:$true] %s45_s1  ;;  %s148_s22 = int_to_ptr.hbm [resolvable:$true] %s147_s22 }
  0x1d   :  { %s71_s26 = sshll.u32 %s1248_s25, 4  ;;  %s111_s24 = sshll.u32 %s1002_s4, 4  ;;  %s72_s26 = int_to_ptr.hbm [resolvable:$true] %s71_s26  ;;  %s112_s24 = int_to_ptr.vmem [resolvable:$true] %s111_s24 }
  0x1e   :  { %53 = dma.hbm_to_vmem [thread:$0]  %s46_s1, 256, %s48_s23, [#allocation3], %s995_s30, %s995_s30, %s996_s5  }
  0x1f   :  { %79 = dma.hbm_to_vmem [thread:$0]  %s72_s26, 2048, %s74_s29, [#allocation8], %s995_s30, %s995_s30, %s996_s5  }
  0x20   :  { %117 = dma.hbm_to_vmem [thread:$0]  %s110_s27, 2048, %s112_s24, [#allocation11], %s995_s30, %s995_s30, %s996_s5  }
  0x21   :  { %s1003_s1 = smov [#allocation15]  }
  0x22   :  { %s149_s11 = sshll.u32 %s1003_s1, 4  ;;  %s150_s11 = int_to_ptr.vmem [resolvable:$true] %s149_s11 }
  0x23   :  { %155 = dma.hbm_to_vmem [thread:$0]  %s148_s22, 2048, %s150_s11, [#allocation14], %s995_s30, %s995_s30, %s996_s5  }
  0x24   :  { %982 = dma.done.wait [#allocation5], 16  }
  0x25   :  { %983 = vsyncadd [#allocation5], 4294967280 }
  0x26   :  { %984 = dma.done.wait [#allocation3], 256  }
  0x27   :  { %985 = vsyncadd [#allocation3], 4294967040 }
  0x28   :  { %986 = dma.done.wait [#allocation8], 2304  }
  0x29   :  { %987 = vsyncadd [#allocation8], 4294964992 }
  0x2a   :  { %988 = dma.done.wait [#allocation11], 4096  }
  0x2b   :  { %989 = vsyncadd [#allocation11], 4294963200 }
  0x2c   :  { %990 = dma.done.wait [#allocation14], 4096  }
  0x2d   :  { %991 = vsyncadd [#allocation14], 4294963200 }
  0x2e   :  { %190 = sfence }
  0x2f   :  { %v191_v0 = vld [vmem:[#allocation7] sm:$0xff]  ;;  %v1160_v1 = vld [vmem:[#allocation6] sm:$0xff]  ;;  %vm194_vm0 = vcmask 64512   ;;  %v192_v2 = vld [vmem:[#allocation7 + $0x8] sm:$0xff]  ;;  %s243_s19 = sld [smem:[#allocation2]]  ;;  %s708_s15 = sshll.u32 %s1238_s21, 4  ;;  %s709_s15 = int_to_ptr.hbm [resolvable:$true] %s708_s15 }
  0x30   :  { %213 = vmatpush.msra.mxu0 %v191_v0  ;;  %238 = vmatpush.msra.mxu1 %v192_v2  ;;  %v1162_v3 = vld [vmem:[#allocation6 + $0x8] sm:$0xff]  ;;  %v265_v4 = vld [vmem:[#allocation9 + $0x78] sm:$0xff]  ;;  %v264_v5 = vld [vmem:[#allocation9 + $0x70] sm:$0xff]  ;;  %s1249_s26 = sld [smem:[#allocation27_spill]] }
  0x31   :  { %725 = vmatmul.msk.f32.vlgmr.msra.gmra.mxu0 %vm194_vm0, %v1160_v1  ;;  %726 = vmatmul.msk.f32.vlgmr.msra.gmra.mxu1 %vm194_vm0, %v1162_v3  ;;  %v263_v6 = vld [vmem:[#allocation9 + $0x68] sm:$0xff]  ;;  %v262_v7 = vld [vmem:[#allocation9 + $0x60] sm:$0xff]  ;;  %v261_v8 = vld [vmem:[#allocation9 + $0x58] sm:$0xff]  ;;  %s1250_s3 = sld [smem:[#allocation28_spill]] }
  0x32   :  { %272 = vmatpush.msra.mxu2 %v265_v4  ;;  %v260_v9 = vld [vmem:[#allocation9 + $0x50] sm:$0xff]  ;;  %v259_v10 = vld [vmem:[#allocation9 + $0x48] sm:$0xff]  ;;  %v258_v11 = vld [vmem:[#allocation9 + $0x40] sm:$0xff] }
  0x33   :  { %v257_v12 = vld [vmem:[#allocation9 + $0x38] sm:$0xff]  ;;  %v256_v13 = vld [vmem:[#allocation9 + $0x30] sm:$0xff]  ;;  %v255_v14 = vld [vmem:[#allocation9 + $0x28] sm:$0xff] }
  0x34   :  { %273 = vmatpush.msra.mxu2 %v264_v5  ;;  %v254_v15 = vld [vmem:[#allocation9 + $0x20] sm:$0xff]  ;;  %v253_v16 = vld [vmem:[#allocation9 + $0x18] sm:$0xff]  ;;  %v252_v17 = vld [vmem:[#allocation9 + $0x10] sm:$0xff] }
  0x35   :  { %v251_v18 = vld [vmem:[#allocation9 + $0x8] sm:$0xff]  ;;  %v250_v19 = vld [vmem:[#allocation9] sm:$0xff]  ;;  %s244_s23 = sadd.f32 1.0, %s243_s19  ;;  %v355_v33 = vld [vmem:[#allocation10 + $0x78] sm:$0xff] }
  0x36   :  { %274 = vmatpush.msra.mxu2 %v263_v6  ;;  %v757_v28 = vld [vmem:[%s1249_s26] ss:$0 sm:$0xff]  ;;  %360 = vmatpush.msra.mxu3 %v355_v33  ;;  %v354_v35 = vld [vmem:[#allocation10 + $0x70] sm:$0xff]  ;;  %v353_v37 = vld [vmem:[#allocation10 + $0x68] sm:$0xff] }
  0x37   :  { %v245_v20 = vstv %s244_s23  ;;  %v352_v39 = vld [vmem:[#allocation10 + $0x60] sm:$0xff]  ;;  %v351_v41 = vld [vmem:[#allocation10 + $0x58] sm:$0xff]  ;;  %v350_v43 = vld [vmem:[#allocation10 + $0x50] sm:$0xff] }
  0x38   :  { %275 = vmatpush.msra.mxu2 %v262_v7  ;;  %v246_v21 = vmul.f32 %v245_v20, %v191_v0  ;;  %v247_v24 = vmul.f32 %v245_v20, %v192_v2  ;;  %361 = vmatpush.msra.mxu3 %v354_v35  ;;  %v349_v45 = vld [vmem:[#allocation10 + $0x48] sm:$0xff]  ;;  %v348_v47 = vld [vmem:[#allocation10 + $0x40] sm:$0xff]  ;;  %v347_v50 = vld [vmem:[#allocation10 + $0x38] sm:$0xff] }
  0x39   :  { %v346_v53 = vld [vmem:[#allocation10 + $0x30] sm:$0xff]  ;;  %v345_v55 = vld [vmem:[#allocation10 + $0x28] sm:$0xff]  ;;  %v344_v57 = vld [vmem:[#allocation10 + $0x20] sm:$0xff] }
  0x3a   :  { %276 = vmatpush.msra.mxu2 %v261_v8  ;;  %362 = vmatpush.msra.mxu3 %v353_v37  ;;  %v343_v59 = vld [vmem:[#allocation10 + $0x18] sm:$0xff]  ;;  %v342_v60 = vld [vmem:[#allocation10 + $0x10] sm:$0xff]  ;;  %v341_v62 = vld [vmem:[#allocation10 + $0x8] sm:$0xff] }
  0x3b   :  { %v340_v0 = vld [vmem:[#allocation10] sm:$0xff] }
  0x3c   :  { %277 = vmatpush.msra.mxu2 %v260_v9  ;;  %363 = vmatpush.msra.mxu3 %v352_v39 }
  0x3e   :  { %278 = vmatpush.msra.mxu2 %v259_v10  ;;  %364 = vmatpush.msra.mxu3 %v351_v41 }
  0x40   :  { %279 = vmatpush.msra.mxu2 %v258_v11  ;;  %365 = vmatpush.msra.mxu3 %v350_v43 }
  0x42   :  { %280 = vmatpush.msra.mxu2 %v257_v12  ;;  %366 = vmatpush.msra.mxu3 %v349_v45 }
  0x44   :  { %281 = vmatpush.msra.mxu2 %v256_v13  ;;  %367 = vmatpush.msra.mxu3 %v348_v47  ;;  %v758_v13 = vld [vmem:[%s1250_s3] ss:$0 sm:$0xff] }
  0x46   :  { %282 = vmatpush.msra.mxu2 %v255_v14  ;;  %368 = vmatpush.msra.mxu3 %v347_v50 }
  0x48   :  { %283 = vmatpush.msra.mxu2 %v254_v15  ;;  %369 = vmatpush.msra.mxu3 %v346_v53 }
  0x4a   :  { %284 = vmatpush.msra.mxu2 %v253_v16  ;;  %370 = vmatpush.msra.mxu3 %v345_v55  ;;  %v759_v16 = vld [vmem:[%s1223_s6] ss:$0 sm:$0xff] }
  0x4c   :  { %285 = vmatpush.msra.mxu2 %v252_v17  ;;  %371 = vmatpush.msra.mxu3 %v344_v57 }
  0x4e   :  { %286 = vmatpush.msra.mxu2 %v251_v18  ;;  %372 = vmatpush.msra.mxu3 %v343_v59 }
  0x50   :  { %287 = vmatpush.msra.mxu2 %v250_v19  ;;  %373 = vmatpush.msra.mxu3 %v342_v60  ;;  %v762_v60 = vld [vmem:[%s1227_s10] ss:$0 sm:$0xff] }
  0x52   :  { %374 = vmatpush.msra.mxu3 %v341_v62 }
  0x54   :  { %375 = vmatpush.msra.mxu3 %v340_v0 }
  0xae   :  { %v215_v22 = vpop.f32.mrf.mxu0  ;;  %v240_v25 = vpop.f32.mrf.mxu1 }
  0xaf   :  { %v248_v23 = vadd.f32 %v246_v21, %v215_v22  ;;  %v249_v26 = vadd.f32 %v247_v24, %v240_v25  ;;  %v760_v25 = vld [vmem:[%s1225_s8] ss:$0 sm:$0xff] }
  0xb1   :  { %288 = vmatmul.f32.vlgmr.msra.gmra.mxu2 %v248_v23 }
  0xb9   :  { %291 = vmatmul.f32.gmra.mxu2 %v249_v26 }
 0x134   :  { %v289_v27 = vpop.f32.mrf.mxu2 }
 0x135   :  { %v290_v30 = vadd.f32 %v757_v28, %v289_v27 }
 0x13c   :  { %v292_v29 = vpop.f32.mrf.mxu2 }
 0x13d   :  { %v293_v31 = vadd.f32 %v757_v28, %v292_v29 }
 0x13f   :  { %v295_v32 = vadd.f32 %v293_v31, %v290_v30 }
 0x141   :  { %v296_v34 = vrot.slane %v295_v32, 4 }
 0x143   :  { %v297_v36 = vadd.f32 %v296_v34, %v295_v32 }
 0x145   :  { %v298_v38 = vrot.slane %v297_v36, 2 }
 0x147   :  { %v299_v40 = vadd.f32 %v298_v38, %v297_v36 }
 0x149   :  { %v300_v42 = vrot.slane %v299_v40, 1 }
 0x14b   :  { %v301_v44 = vadd.f32 %v300_v42, %v299_v40 }
 0x14d   :  { %v302_v46 = vmul.f32 0.0625, %v301_v44 }
 0x14f   :  { %v303_v48 = vsub.f32 %v290_v30, %v302_v46  ;;  %v304_v49 = vsub.f32 %v293_v31, %v302_v46 }
 0x151   :  { %v305_v51 = vmul.f32 %v303_v48, %v303_v48  ;;  %v306_v52 = vmul.f32 %v304_v49, %v304_v49 }
 0x153   :  { %v307_v54 = vadd.f32 %v306_v52, %v305_v51 }
 0x155   :  { %v308_v56 = vrot.slane %v307_v54, 4 }
 0x157   :  { %v309_v58 = vadd.f32 %v308_v56, %v307_v54  ;;  %v761_v56 = vld [vmem:[%s1226_s9] ss:$0 sm:$0xff]  ;;  %s729_s9 = sld [smem:[#allocation2 + $0x1]] }
 0x159   :  { %v310_v61 = vrot.slane %v309_v58, 2 }
 0x15b   :  { %v311_v63 = vadd.f32 %v310_v61, %v309_v58 }
 0x15d   :  { %v312_v2 = vrot.slane %v311_v63, 1  ;;  %s471_s10 = sadd.f32 1.0, %s729_s9 }
 0x15f   :  { %v313_v4 = vadd.f32 %v312_v2, %v311_v63 }
 0x161   :  { %v314_v5 = vmul.f32 0.0625, %v313_v4 }
 0x163   :  { %v315_v6 = vadd.f32 1e-05, %v314_v5  ;;  %v492_v5 = vld [vmem:[#allocation12 + $0x78] sm:$0xff] }
 0x165   :  { %770 = vrsqrt.f32 %v315_v6  ;;  %vm322_vm2 = vweird.f32 %v315_v6 }
 0x16b   :  { %v771_v7 = vpop.eup %770 }
 0x16c   :  { %v317_v8 = vmul.f32 %v771_v7, %v315_v6  ;;  %vm323_vm1 = vweird.f32 %v771_v7  ;;  %v491_v6 = vld [vmem:[#allocation12 + $0x70] sm:$0xff] }
 0x16d   :  { %vm324_vm3 = vmor %vm322_vm2, %vm323_vm1 }
 0x16e   :  { %v318_v9 = vmul.f32 %v771_v7, %v317_v8  ;;  %v489_v8 = vld [vmem:[#allocation12 + $0x60] sm:$0xff] }
 0x170   :  { %v319_v10 = vmul.f32 0.5, %v318_v9  ;;  %v488_v9 = vld [vmem:[#allocation12 + $0x58] sm:$0xff] }
 0x172   :  { %v320_v11 = vsub.f32 1.5, %v319_v10  ;;  %v487_v10 = vld [vmem:[#allocation12 + $0x50] sm:$0xff] }
 0x174   :  { %v321_v12 = vmul.f32 %v771_v7, %v320_v11  ;;  %v486_v11 = vld [vmem:[#allocation12 + $0x48] sm:$0xff] }
 0x176   :  { %v325_v14 = vsel %vm324_vm3, %v771_v7, %v321_v12  ;;  %v490_v7 = vld [vmem:[#allocation12 + $0x68] sm:$0xff]  ;;  %v485_v12 = vld [vmem:[#allocation12 + $0x40] sm:$0xff] }
 0x177   :  { %v326_v15 = vmul.f32 %v325_v14, %v303_v48  ;;  %v327_v17 = vmul.f32 %v325_v14, %v304_v49  ;;  %v482_v14 = vld [vmem:[#allocation12 + $0x28] sm:$0xff] }
 0x179   :  { %v331_v18 = vmul.f32 %v758_v13, %v326_v15  ;;  %v332_v21 = vmul.f32 %v758_v13, %v327_v17  ;;  %v484_v13 = vld [vmem:[#allocation12 + $0x38] sm:$0xff]  ;;  %v478_v17 = vld [vmem:[#allocation12 + $0x8] sm:$0xff] }
 0x17a   :  { %v480_v15 = vld [vmem:[#allocation12 + $0x18] sm:$0xff] }
 0x17b   :  { %v336_v19 = vadd.f32 %v759_v16, %v331_v18  ;;  %v337_v22 = vadd.f32 %v759_v16, %v332_v21  ;;  %v479_v16 = vld [vmem:[#allocation12 + $0x10] sm:$0xff]  ;;  %v477_v18 = vld [vmem:[#allocation12] sm:$0xff] }
 0x17d   :  { %v338_v20 = vmax.f32 %v336_v19, 0.0  ;;  %v339_v23 = vmax.f32 %v337_v22, 0.0  ;;  %v472_v19 = vstv %s471_s10 }
 0x17f   :  { %376 = vmatmul.f32.vlgmr.msra.gmra.mxu3 %v338_v20 }
 0x187   :  { %379 = vmatmul.f32.gmra.mxu3 %v339_v23 }
 0x202   :  { %v377_v24 = vpop.f32.mrf.mxu3 }
 0x203   :  { %v378_v27 = vadd.f32 %v760_v25, %v377_v24 }
 0x20a   :  { %v380_v26 = vpop.f32.mrf.mxu3 }
 0x20b   :  { %v381_v28 = vadd.f32 %v760_v25, %v380_v26 }
 0x20d   :  { %v385_v29 = vadd.f32 %v381_v28, %v378_v27 }
 0x20f   :  { %v386_v30 = vrot.slane %v385_v29, 4 }
 0x211   :  { %v387_v31 = vadd.f32 %v386_v30, %v385_v29 }
 0x213   :  { %v388_v32 = vrot.slane %v387_v31, 2 }
 0x215   :  { %v389_v33 = vadd.f32 %v388_v32, %v387_v31  ;;  %v582_v32 = vld [vmem:[#allocation13 + $0x78] sm:$0xff] }
 0x217   :  { %v390_v34 = vrot.slane %v389_v33, 1 }
 0x219   :  { %v391_v35 = vadd.f32 %v390_v34, %v389_v33  ;;  %v581_v34 = vld [vmem:[#allocation13 + $0x70] sm:$0xff] }
 0x21b   :  { %v392_v36 = vmul.f32 0.0625, %v391_v35 }
 0x21d   :  { %v393_v37 = vsub.f32 %v378_v27, %v392_v36  ;;  %v394_v38 = vsub.f32 %v381_v28, %v392_v36  ;;  %v763_v27 = vld [vmem:[%s1229_s12] ss:$0 sm:$0xff]  ;;  %v580_v36 = vld [vmem:[#allocation13 + $0x68] sm:$0xff] }
 0x21f   :  { %v395_v39 = vmul.f32 %v393_v37, %v393_v37  ;;  %v396_v40 = vmul.f32 %v394_v38, %v394_v38 }
 0x221   :  { %v397_v41 = vadd.f32 %v396_v40, %v395_v39  ;;  %v578_v40 = vld [vmem:[#allocation13 + $0x58] sm:$0xff] }
 0x223   :  { %v398_v42 = vrot.slane %v397_v41, 4 }
 0x225   :  { %v399_v43 = vadd.f32 %v398_v42, %v397_v41  ;;  %v577_v42 = vld [vmem:[#allocation13 + $0x50] sm:$0xff] }
 0x227   :  { %v400_v44 = vrot.slane %v399_v43, 2 }
 0x229   :  { %v401_v45 = vadd.f32 %v400_v44, %v399_v43  ;;  %v576_v44 = vld [vmem:[#allocation13 + $0x48] sm:$0xff] }
 0x22b   :  { %v402_v46 = vrot.slane %v401_v45, 1 }
 0x22d   :  { %v403_v47 = vadd.f32 %v402_v46, %v401_v45  ;;  %v575_v46 = vld [vmem:[#allocation13 + $0x40] sm:$0xff] }
 0x22f   :  { %v404_v48 = vmul.f32 0.0625, %v403_v47 }
 0x231   :  { %v405_v49 = vadd.f32 1e-05, %v404_v48 }
 0x233   :  { %772 = vrsqrt.f32 %v405_v49  ;;  %vm412_vm5 = vweird.f32 %v405_v49 }
 0x239   :  { %v773_v50 = vpop.eup %772 }
 0x23a   :  { %v407_v51 = vmul.f32 %v773_v50, %v405_v49  ;;  %vm413_vm4 = vweird.f32 %v773_v50  ;;  %v574_v49 = vld [vmem:[#allocation13 + $0x38] sm:$0xff] }
 0x23b   :  { %vm414_vm6 = vmor %vm412_vm5, %vm413_vm4 }
 0x23c   :  { %v408_v52 = vmul.f32 %v773_v50, %v407_v51 }
 0x23e   :  { %v409_v53 = vmul.f32 0.5, %v408_v52  ;;  %v573_v52 = vld [vmem:[#allocation13 + $0x30] sm:$0xff] }
 0x240   :  { %v410_v54 = vsub.f32 1.5, %v409_v53 }
 0x242   :  { %v411_v55 = vmul.f32 %v773_v50, %v410_v54  ;;  %v572_v54 = vld [vmem:[#allocation13 + $0x28] sm:$0xff] }
 0x244   :  { %v415_v57 = vsel %vm414_vm6, %v773_v50, %v411_v55 }
 0x245   :  { %v417_v58 = vmul.f32 %v415_v57, %v394_v38  ;;  %v416_v59 = vmul.f32 %v415_v57, %v393_v37  ;;  %v579_v38 = vld [vmem:[#allocation13 + $0x60] sm:$0xff] }
 0x247   :  { %v421_v61 = vmul.f32 %v761_v56, %v416_v59  ;;  %v422_v62 = vmul.f32 %v761_v56, %v417_v58  ;;  %v571_v56 = vld [vmem:[#allocation13 + $0x20] sm:$0xff]  ;;  %v570_v58 = vld [vmem:[#allocation13 + $0x18] sm:$0xff] }
 0x249   :  { %v426_v63 = vadd.f32 %v762_v60, %v421_v61  ;;  %v427_v0 = vadd.f32 %v762_v60, %v422_v62  ;;  %v569_v60 = vld [vmem:[#allocation13 + $0x10] sm:$0xff]  ;;  %v568_v61 = vld [vmem:[#allocation13 + $0x8] sm:$0xff] }
 0x24b   :  { %v428_v2 = vmax.f32 %v426_v63, 0.0  ;;  %v429_v4 = vmax.f32 %v427_v0, 0.0  ;;  %v567_v63 = vld [vmem:[#allocation13] sm:$0xff] }
 0x24d   :  { %445 = vmatpush.msrb.mxu0 %v428_v2  ;;  %465 = vmatpush.msrb.mxu1 %v429_v4  ;;  %v473_v20 = vmul.f32 %v472_v19, %v428_v2  ;;  %v474_v24 = vmul.f32 %v472_v19, %v429_v4 }
 0x24e   :  { %727 = vmatmul.msk.f32.vlgmr.msrb.gmra.mxu0 %vm194_vm0, %v1160_v1  ;;  %728 = vmatmul.msk.f32.vlgmr.msrb.gmra.mxu1 %vm194_vm0, %v1162_v3  ;;  %v483_v1 = vld [vmem:[#allocation12 + $0x30] sm:$0xff]  ;;  %v481_v3 = vld [vmem:[#allocation12 + $0x20] sm:$0xff] }
 0x24f   :  { %499 = vmatpush.msra.mxu0 %v492_v5  ;;  %587 = vmatpush.msra.mxu1 %v582_v32 }
 0x251   :  { %500 = vmatpush.msra.mxu0 %v491_v6  ;;  %588 = vmatpush.msra.mxu1 %v581_v34 }
 0x253   :  { %501 = vmatpush.msra.mxu0 %v490_v7  ;;  %589 = vmatpush.msra.mxu1 %v580_v36 }
 0x255   :  { %502 = vmatpush.msra.mxu0 %v489_v8  ;;  %590 = vmatpush.msra.mxu1 %v579_v38 }
 0x257   :  { %503 = vmatpush.msra.mxu0 %v488_v9  ;;  %591 = vmatpush.msra.mxu1 %v578_v40 }
 0x259   :  { %504 = vmatpush.msra.mxu0 %v487_v10  ;;  %592 = vmatpush.msra.mxu1 %v577_v42 }
 0x25b   :  { %505 = vmatpush.msra.mxu0 %v486_v11  ;;  %593 = vmatpush.msra.mxu1 %v576_v44  ;;  %v664_v44 = vld [vmem:[#allocation15 + $0x38] sm:$0xff] }
 0x25d   :  { %506 = vmatpush.msra.mxu0 %v485_v12  ;;  %594 = vmatpush.msra.mxu1 %v575_v46  ;;  %v764_v12 = vld [vmem:[%s1230_s13] ss:$0 sm:$0xff] }
 0x25f   :  { %507 = vmatpush.msra.mxu0 %v484_v13  ;;  %595 = vmatpush.msra.mxu1 %v574_v49  ;;  %v662_v49 = vld [vmem:[#allocation15 + $0x28] sm:$0xff] }
 0x261   :  { %508 = vmatpush.msra.mxu0 %v483_v1  ;;  %596 = vmatpush.msra.mxu1 %v573_v52 }
 0x263   :  { %509 = vmatpush.msra.mxu0 %v482_v14  ;;  %597 = vmatpush.msra.mxu1 %v572_v54  ;;  %v765_v14 = vld [vmem:[%s1231_s14] ss:$0 sm:$0xff]  ;;  %v659_v54 = vld [vmem:[#allocation15 + $0x10] sm:$0xff] }
 0x265   :  { %510 = vmatpush.msra.mxu0 %v481_v3  ;;  %598 = vmatpush.msra.mxu1 %v571_v56  ;;  %v658_v56 = vld [vmem:[#allocation15 + $0x8] sm:$0xff] }
 0x267   :  { %511 = vmatpush.msra.mxu0 %v480_v15  ;;  %599 = vmatpush.msra.mxu1 %v570_v58  ;;  %v657_v58 = vld [vmem:[#allocation15] sm:$0xff] }
 0x269   :  { %512 = vmatpush.msra.mxu0 %v479_v16  ;;  %600 = vmatpush.msra.mxu1 %v569_v60 }
 0x26b   :  { %513 = vmatpush.msra.mxu0 %v478_v17  ;;  %601 = vmatpush.msra.mxu1 %v568_v61 }
 0x26d   :  { %514 = vmatpush.msra.mxu0 %v477_v18  ;;  %602 = vmatpush.msra.mxu1 %v567_v63 }
 0x2cb   :  { %v447_v21 = vpop.f32.mrf.mxu0  ;;  %v467_v23 = vpop.f32.mrf.mxu1 }
 0x2cc   :  { %v475_v22 = vadd.f32 %v473_v20, %v447_v21  ;;  %v476_v25 = vadd.f32 %v474_v24, %v467_v23 }
 0x2ce   :  { %515 = vmatmul.f32.vlgmr.msra.gmra.mxu0 %v475_v22  ;;  %v766_v22 = vld [vmem:[%s1233_s16] ss:$0 sm:$0xff] }
 0x2d6   :  { %518 = vmatmul.f32.gmra.mxu0 %v476_v25 }
 0x34b   :  { %v516_v26 = vpop.f32.mrf.mxu0 }
 0x34c   :  { %v517_v29 = vadd.f32 %v763_v27, %v516_v26 }
 0x353   :  { %v519_v28 = vpop.f32.mrf.mxu0 }
 0x354   :  { %v520_v30 = vadd.f32 %v763_v27, %v519_v28  ;;  %v672_v27 = vld [vmem:[#allocation15 + $0x78] sm:$0xff] }
 0x355   :  { %677 = vmatpush.msrb.mxu2 %v672_v27  ;;  %730 = vmatpush.msrb.mxu3 %v672_v27 }
 0x356   :  { %v522_v31 = vadd.f32 %v520_v30, %v517_v29 }
 0x358   :  { %v523_v33 = vrot.slane %v522_v31, 4 }
 0x35a   :  { %v524_v35 = vadd.f32 %v523_v33, %v522_v31  ;;  %v670_v31 = vld [vmem:[#allocation15 + $0x68] sm:$0xff]  ;;  %v669_v33 = vld [vmem:[#allocation15 + $0x60] sm:$0xff] }
 0x35c   :  { %v525_v37 = vrot.slane %v524_v35, 2 }
 0x35e   :  { %v526_v39 = vadd.f32 %v525_v37, %v524_v35  ;;  %v668_v35 = vld [vmem:[#allocation15 + $0x58] sm:$0xff]  ;;  %v667_v37 = vld [vmem:[#allocation15 + $0x50] sm:$0xff] }
 0x360   :  { %v527_v41 = vrot.slane %v526_v39, 1 }
 0x362   :  { %v528_v43 = vadd.f32 %v527_v41, %v526_v39  ;;  %v666_v39 = vld [vmem:[#allocation15 + $0x48] sm:$0xff]  ;;  %v665_v41 = vld [vmem:[#allocation15 + $0x40] sm:$0xff] }
 0x364   :  { %v529_v45 = vmul.f32 0.0625, %v528_v43 }
 0x366   :  { %v530_v47 = vsub.f32 %v517_v29, %v529_v45  ;;  %v531_v48 = vsub.f32 %v520_v30, %v529_v45  ;;  %v671_v29 = vld [vmem:[#allocation15 + $0x70] sm:$0xff] }
 0x367   :  { %678 = vmatpush.msrb.mxu2 %v671_v29  ;;  %731 = vmatpush.msrb.mxu3 %v671_v29 }
 0x368   :  { %v532_v50 = vmul.f32 %v530_v47, %v530_v47  ;;  %v533_v51 = vmul.f32 %v531_v48, %v531_v48 }
 0x369   :  { %679 = vmatpush.msrb.mxu2 %v670_v31  ;;  %732 = vmatpush.msrb.mxu3 %v670_v31 }
 0x36a   :  { %v534_v53 = vadd.f32 %v533_v51, %v532_v50  ;;  %v661_v51 = vld [vmem:[#allocation15 + $0x20] sm:$0xff] }
 0x36b   :  { %680 = vmatpush.msrb.mxu2 %v669_v33  ;;  %733 = vmatpush.msrb.mxu3 %v669_v33 }
 0x36c   :  { %v535_v55 = vrot.slane %v534_v53, 4 }
 0x36d   :  { %681 = vmatpush.msrb.mxu2 %v668_v35  ;;  %734 = vmatpush.msrb.mxu3 %v668_v35 }
 0x36e   :  { %v536_v57 = vadd.f32 %v535_v55, %v534_v53  ;;  %v660_v53 = vld [vmem:[#allocation15 + $0x18] sm:$0xff] }
 0x36f   :  { %682 = vmatpush.msrb.mxu2 %v667_v37  ;;  %735 = vmatpush.msrb.mxu3 %v667_v37 }
 0x370   :  { %v537_v59 = vrot.slane %v536_v57, 2 }
 0x371   :  { %683 = vmatpush.msrb.mxu2 %v666_v39  ;;  %736 = vmatpush.msrb.mxu3 %v666_v39 }
 0x372   :  { %v538_v62 = vadd.f32 %v537_v59, %v536_v57 }
 0x373   :  { %684 = vmatpush.msrb.mxu2 %v665_v41  ;;  %737 = vmatpush.msrb.mxu3 %v665_v41 }
 0x374   :  { %v539_v0 = vrot.slane %v538_v62, 1 }
 0x375   :  { %685 = vmatpush.msrb.mxu2 %v664_v44  ;;  %738 = vmatpush.msrb.mxu3 %v664_v44 }
 0x376   :  { %v540_v2 = vadd.f32 %v539_v0, %v538_v62 }
 0x378   :  { %v541_v4 = vmul.f32 0.0625, %v540_v2 }
 0x37a   :  { %v542_v5 = vadd.f32 1e-05, %v541_v4 }
 0x37c   :  { %774 = vrsqrt.f32 %v542_v5  ;;  %vm549_vm8 = vweird.f32 %v542_v5 }
 0x382   :  { %v775_v6 = vpop.eup %774 }
 0x383   :  { %v544_v7 = vmul.f32 %v775_v6, %v542_v5  ;;  %vm550_vm7 = vweird.f32 %v775_v6 }
 0x384   :  { %vm551_vm9 = vmor %vm549_vm8, %vm550_vm7 }
 0x385   :  { %v545_v8 = vmul.f32 %v775_v6, %v544_v7  ;;  %v767_v7 = vld [vmem:[%s1234_s17] ss:$0 sm:$0xff]  ;;  %s1004_s17 = smov [#allocation16]  }
 0x386   :  { %s706_s3 = sshll.u32 %s1004_s17, 4  ;;  %s707_s3 = int_to_ptr.vmem [resolvable:$true] %s706_s3 }
 0x387   :  { %v546_v9 = vmul.f32 0.5, %v545_v8 }
 0x389   :  { %v547_v10 = vsub.f32 1.5, %v546_v9 }
 0x38b   :  { %v548_v11 = vmul.f32 %v775_v6, %v547_v10 }
 0x38d   :  { %v552_v13 = vsel %vm551_vm9, %v775_v6, %v548_v11  ;;  %v768_v11 = vld [vmem:[%s1235_s18] ss:$0 sm:$0xff] }
 0x38e   :  { %v553_v1 = vmul.f32 %v552_v13, %v530_v47  ;;  %v554_v3 = vmul.f32 %v552_v13, %v531_v48  ;;  %v663_v47 = vld [vmem:[#allocation15 + $0x30] sm:$0xff] }
 0x38f   :  { %686 = vmatpush.msrb.mxu2 %v663_v47  ;;  %739 = vmatpush.msrb.mxu3 %v663_v47 }
 0x390   :  { %v558_v15 = vmul.f32 %v764_v12, %v553_v1  ;;  %v559_v18 = vmul.f32 %v764_v12, %v554_v3 }
 0x391   :  { %687 = vmatpush.msrb.mxu2 %v662_v49  ;;  %740 = vmatpush.msrb.mxu3 %v662_v49 }
 0x392   :  { %v563_v16 = vadd.f32 %v765_v14, %v558_v15  ;;  %v564_v19 = vadd.f32 %v765_v14, %v559_v18 }
 0x393   :  { %688 = vmatpush.msrb.mxu2 %v661_v51  ;;  %741 = vmatpush.msrb.mxu3 %v661_v51 }
 0x394   :  { %v565_v17 = vmax.f32 %v563_v16, 0.0  ;;  %v566_v20 = vmax.f32 %v564_v19, 0.0  ;;  %v769_v16 = vld [vmem:[%s1237_s20] ss:$0 sm:$0xff] }
 0x395   :  { %689 = vmatpush.msrb.mxu2 %v660_v53  ;;  %742 = vmatpush.msrb.mxu3 %v660_v53 }
 0x396   :  { %603 = vmatmul.f32.vlgmr.msra.gmra.mxu1 %v565_v17 }
 0x397   :  { %690 = vmatpush.msrb.mxu2 %v659_v54  ;;  %743 = vmatpush.msrb.mxu3 %v659_v54 }
 0x399   :  { %691 = vmatpush.msrb.mxu2 %v658_v56  ;;  %744 = vmatpush.msrb.mxu3 %v658_v56 }
 0x39b   :  { %692 = vmatpush.msrb.mxu2 %v657_v58  ;;  %745 = vmatpush.msrb.mxu3 %v657_v58 }
 0x39e   :  { %606 = vmatmul.f32.gmra.mxu1 %v566_v20 }
 0x413   :  { %v604_v21 = vpop.f32.mrf.mxu1 }
 0x414   :  { %v605_v24 = vadd.f32 %v766_v22, %v604_v21 }
 0x41b   :  { %v607_v23 = vpop.f32.mrf.mxu1 }
 0x41c   :  { %v608_v25 = vadd.f32 %v766_v22, %v607_v23 }
 0x41e   :  { %v612_v26 = vadd.f32 %v608_v25, %v605_v24 }
 0x420   :  { %v613_v28 = vrot.slane %v612_v26, 4 }
 0x422   :  { %v614_v30 = vadd.f32 %v613_v28, %v612_v26 }
 0x424   :  { %v615_v32 = vrot.slane %v614_v30, 2 }
 0x426   :  { %v616_v34 = vadd.f32 %v615_v32, %v614_v30 }
 0x428   :  { %v617_v36 = vrot.slane %v616_v34, 1 }
 0x42a   :  { %v618_v38 = vadd.f32 %v617_v36, %v616_v34 }
 0x42c   :  { %v619_v40 = vmul.f32 0.0625, %v618_v38 }
 0x42e   :  { %v620_v42 = vsub.f32 %v605_v24, %v619_v40  ;;  %v621_v43 = vsub.f32 %v608_v25, %v619_v40 }
 0x430   :  { %v622_v45 = vmul.f32 %v620_v42, %v620_v42  ;;  %v623_v46 = vmul.f32 %v621_v43, %v621_v43 }
 0x432   :  { %v624_v48 = vadd.f32 %v623_v46, %v622_v45 }
 0x434   :  { %v625_v50 = vrot.slane %v624_v48, 4 }
 0x436   :  { %v626_v52 = vadd.f32 %v625_v50, %v624_v48 }
 0x438   :  { %v627_v55 = vrot.slane %v626_v52, 2 }
 0x43a   :  { %v628_v57 = vadd.f32 %v627_v55, %v626_v52 }
 0x43c   :  { %v629_v59 = vrot.slane %v628_v57, 1 }
 0x43e   :  { %v630_v60 = vadd.f32 %v629_v59, %v628_v57 }
 0x440   :  { %v631_v61 = vmul.f32 0.0625, %v630_v60 }
 0x442   :  { %v632_v62 = vadd.f32 1e-05, %v631_v61 }
 0x444   :  { %776 = vrsqrt.f32 %v632_v62  ;;  %vm639_vm11 = vweird.f32 %v632_v62 }
 0x44a   :  { %v777_v63 = vpop.eup %776 }
 0x44b   :  { %v634_v0 = vmul.f32 %v777_v63, %v632_v62  ;;  %vm640_vm10 = vweird.f32 %v777_v63 }
 0x44c   :  { %vm641_vm12 = vmor %vm639_vm11, %vm640_vm10 }
 0x44d   :  { %v635_v2 = vmul.f32 %v777_v63, %v634_v0 }
 0x44f   :  { %v636_v4 = vmul.f32 0.5, %v635_v2 }
 0x451   :  { %v637_v5 = vsub.f32 1.5, %v636_v4 }
 0x453   :  { %v638_v6 = vmul.f32 %v777_v63, %v637_v5 }
 0x455   :  { %v642_v8 = vsel %vm641_vm12, %v777_v63, %v638_v6 }
 0x456   :  { %v643_v9 = vmul.f32 %v642_v8, %v620_v42  ;;  %v644_v10 = vmul.f32 %v642_v8, %v621_v43 }
 0x458   :  { %v648_v12 = vmul.f32 %v767_v7, %v643_v9  ;;  %v649_v13 = vmul.f32 %v767_v7, %v644_v10 }
 0x45a   :  { %v653_v1 = vadd.f32 %v768_v11, %v648_v12  ;;  %v654_v14 = vadd.f32 %v768_v11, %v649_v13 }
 0x45c   :  { %v655_v3 = vmax.f32 %v653_v1, 0.0  ;;  %v656_v15 = vmax.f32 %v654_v14, 0.0 }
 0x45e   :  { %693 = vmatmul.f32.vlgmr.msrb.gmra.mxu2 %v655_v3  ;;  %696 = vmatmul.f32.vlgmr.msrb.gmra.mxu3 %v656_v15 }
 0x4e1   :  { %v694_v17 = vpop.f32.mrf.mxu2  ;;  %v697_v18 = vpop.f32.mrf.mxu3 }
 0x4e2   :  { %v695_v19 = vadd.f32 %v769_v16, %v694_v17  ;;  %v698_v20 = vadd.f32 %v769_v16, %v697_v18 }
 0x4e4   :  { %700 = vst [vmem:[#allocation16] sm:$0xff] %v695_v19 }
 0x4e5   :  { %701 = vst [vmem:[#allocation16 + $0x8] sm:$0xff] %v698_v20 }
 0x4e6   :  { %714 = dma.vmem_to_hbm [thread:$0]  %s707_s3, 256, %s709_s15, [#allocation4], %s995_s30, %s995_s30, %s996_s5  }
 0x4e7   :  { %992 = dma.done.wait [#allocation4], 256  }
 0x4e8   :  { %993 = vsyncadd [#allocation4], 4294967040 }
 0x4e9   :  { %719 = vsyncpa [#allocation3], 1 }
 0x4ea   :  { %720 = vsyncpa [#allocation8], 1 }
 0x4eb   :  { %721 = vsyncpa [#allocation11], 1 }
 0x4ec   :  { %722 = vsyncpa [#allocation14], 1 }
 0x4ed   :  { %723 = vsyncpa [#allocation4], 1 }
 0x4ee   :  { %724 = vsyncpa [#allocation5], 1 }

</bundles_post_ra>
